<compile_context>
chip_gen: v6e
topology: v6e:2x2x1
jax: 0.10.0
libtpu: 0.0.40
codegen_flags: <defaults>
</compile_context>

<pallas_src>
import functools

import jax
import jax.numpy as jnp
from jax.experimental import pallas as pl
from jax.experimental.pallas import tpu as pltpu

EPS = 1e-07


def _contrast_loss_kernel(x_ref, o_ref, *, inv, c_inv, bsz, tb, needs_mask):
    # x_ref: (tb, n) block in VMEM (native dtype); o_ref: (1, 1) f32 SMEM slot.
    i = pl.program_id(0)

    def block_partial(mask_rows):
        x = x_ref[...].astype(jnp.float32)
        t = jnp.log(x * inv + c_inv)         # log((x + c) / (m*Pn)), all columns
        pos = jnp.log(x[:, :1] * inv)        # log(x0 / (m*Pn)), column 0 only
        if mask_rows:
            # Zero contributions from rows >= bsz in the (partial) last block.
            # NOTE: keep jnp.where (select) -- it discards NaN/Inf produced by
            # log(garbage) on padded rows; do NOT replace with multiply-masking.
            row = jax.lax.broadcasted_iota(jnp.int32, t.shape, 0) + i * tb
            valid = row < bsz
            t = jnp.where(valid, t, 0.0)
            pos = jnp.where(valid[:, :1], pos, 0.0)
        return jnp.sum(pos) - jnp.sum(t)

    if not needs_mask:
        o_ref[0, 0] = block_partial(False)
    else:
        last = pl.num_programs(0) - 1

        @pl.when(i < last)
        def _full_block():                   # unmasked fast path
            o_ref[0, 0] = block_partial(False)

        @pl.when(i == last)
        def _masked_block():                 # masking only on the last block
            o_ref[0, 0] = block_partial(True)


def _sublane_tile(itemsize):
    # 8 rows for 4-byte, 16 for 2-byte, 32 for 1-byte dtypes.
    return 8 * max(1, 4 // max(1, int(itemsize)))


def _pick_block_rows(bsz, n, itemsize):
    """Largest batch tile whose f32 working block stays <= ~8 MiB, accounting for
    lane padding (ceil(n/128)*128 lanes per row) and sublane packing alignment."""
    lanes = -(-n // 128) * 128
    row_bytes_f32 = lanes * 4                # compute happens in f32 regardless
    budget = 8 * 1024 * 1024
    sub = _sublane_tile(itemsize)
    tb = budget // row_bytes_f32
    if tb >= bsz:
        return bsz                           # single full-batch block
    return max(sub, (tb // sub) * sub)


def contrast_loss(x, n_data, block_rows=None):
    """Pallas equivalent of ContrastLoss(n_data).forward(x). Returns shape (1,)."""
    if x.ndim == 3 and x.shape[-1] == 1:
        x = x[..., 0]
    bsz, n = x.shape
    m = n - 1
    pn = 1.0 / float(n_data)
    mpn = float(m) * pn
    inv = 1.0 / mpn                          # 1 / (m*Pn)
    c_inv = 1.0 + EPS * inv                  # (m*Pn + eps) / (m*Pn)

    itemsize = jnp.dtype(x.dtype).itemsize
    sub = _sublane_tile(itemsize)
    tb = block_rows if block_rows is not None else _pick_block_rows(bsz, n, itemsize)
    tb = min(int(tb), bsz)
    if tb < bsz:
        assert tb % sub == 0, "partial-batch row tile must be sublane aligned"
    grid = pl.cdiv(bsz, tb)
    needs_mask = (bsz % tb) != 0

    kernel = functools.partial(_contrast_loss_kernel, inv=inv, c_inv=c_inv,
                               bsz=bsz, tb=tb, needs_mask=needs_mask)

    cost = pl.CostEstimate(
        flops=3 * bsz * n,                   # mul + add + reduce-add per element
        transcendentals=bsz * (n + 1),       # one log per element + one per row
        bytes_accessed=bsz * n * int(itemsize) + grid * 4)

    # TODO(synk): for very narrow score matrices (n*itemsize < ~512 B) a
    # lane-dense flattened view would avoid sub-128-lane DMA segments; irrelevant
    # for realistic CRD sizes (n ~ 16k), so not implemented here.
    partials = pl.pallas_call(
        kernel,
        out_shape=jax.ShapeDtypeStruct((grid, 1), jnp.float32),
        grid=(grid,),
        in_specs=[pl.BlockSpec((tb, n), lambda i: (i, 0))],
        out_specs=pl.BlockSpec((1, 1), lambda i: (i, 0), memory_space=pltpu.SMEM),
        compiler_params=pltpu.CompilerParams(
            dimension_semantics=("parallel",),        # independent blocks -> 2-TC on v7x
            vmem_limit_bytes=48 * 1024 * 1024),
        cost_estimate=cost,
    )(x)

    # Tiny epilogue: sum over grid-many partials, negate, scale by 1/bsz.
    return (-jnp.sum(partials) / bsz).reshape(1)


def contrast_loss_ref(x, n_data):
    """Pure-JAX reference mirroring the PyTorch forward exactly."""
    if x.ndim == 3 and x.shape[-1] == 1:
        x = x[..., 0]
    x = x.astype(jnp.float32)
    bsz = x.shape[0]
    m = x.shape[1] - 1
    pn = 1.0 / float(n_data)
    p_pos = x[:, 0]
    log_d1 = jnp.log(p_pos / (p_pos + m * pn + EPS))
    p_neg = x[:, 1:]
    log_d0 = jnp.log((m * pn) / (p_neg + m * pn + EPS))
    return (-(jnp.sum(log_d1) + jnp.sum(log_d0)) / bsz).reshape(1)


if __name__ == "__main__":
    n_data = 128

    # Case 1: toy CRD NCE head output (bsz, m+1, 1) -- single full-array block.
    key = jax.random.PRNGKey(0)
    bsz, m = 8, 16
    x = jax.random.uniform(key, (bsz, m + 1, 1), dtype=jnp.float32,
                           minval=1e-3, maxval=1.0)
    out = jax.block_until_ready(contrast_loss(x, n_data))
    ref = contrast_loss_ref(x, n_data)
    assert out.shape == (1,)
    assert jnp.allclose(out, ref, rtol=1e-5, atol=1e-4), (out, ref)

    # Case 2: tiled path, grid > 1, masked last block (bsz=20, tile=8).
    key2 = jax.random.PRNGKey(0)
    bsz2, m2 = 20, 16
    x2 = jax.random.uniform(key2, (bsz2, m2 + 1), dtype=jnp.float32,
                            minval=1e-3, maxval=1.0)
    out2 = jax.block_until_ready(contrast_loss(x2, n_data, block_rows=8))
    ref2 = contrast_loss_ref(x2, n_data)
    assert out2.shape == (1,)
    assert jnp.allclose(out2, ref2, rtol=1e-5, atol=1e-4), (out2, ref2)

    # Case 3: tiled path, grid > 1, no masking (bsz divisible by tile).
    key3 = jax.random.PRNGKey(0)
    bsz3, m3 = 16, 16
    x3 = jax.random.uniform(key3, (bsz3, m3 + 1), dtype=jnp.float32,
                            minval=1e-3, maxval=1.0)
    out3 = jax.block_until_ready(contrast_loss(x3, n_data, block_rows=8))
    ref3 = contrast_loss_ref(x3, n_data)
    assert out3.shape == (1,)
    assert jnp.allclose(out3, ref3, rtol=1e-5, atol=1e-4), (out3, ref3)

    print("KERNEL_OK")
</pallas_src>

<mosaic_0001>
module attributes {stable_mosaic.version = 11 : i64} {
  func.func @_contrast_loss_kernel(%arg0: i32, %arg1: memref<8x17xf32, #tpu.memory_space<vmem>>, %arg2: memref<1x1xf32, #tpu.memory_space<smem>>) attributes {dimension_semantics = [#tpu.dimension_semantics<parallel>], iteration_bounds = array<i64: 1>, scalar_prefetch = 0 : i64, scratch_operands = 0 : i64, tpu.core_type = #tpu.core_type<tc>, window_params = [{transform_indices = @transform_0, window_bounds = array<i64: 8, 17>}, {transform_indices = @transform_1, window_bounds = array<i64: 1, 1>}]} {
    %c0 = arith.constant 0 : index
    %c0_0 = arith.constant 0 : index
    %0 = vector.load %arg1[%c0, %c0_0] : memref<8x17xf32, #tpu.memory_space<vmem>>, vector<8x17xf32>
    %cst = arith.constant 8.000000e+00 : f32
    %1 = vector.broadcast %cst : f32 to vector<8x17xf32>
    %2 = arith.mulf %0, %1 : vector<8x17xf32>
    %cst_1 = arith.constant 1.00000083 : f32
    %3 = vector.broadcast %cst_1 : f32 to vector<8x17xf32>
    %4 = arith.addf %2, %3 : vector<8x17xf32>
    %5 = math.log %4 : vector<8x17xf32>
    %6 = vector.extract_strided_slice %0 {offsets = [0, 0], sizes = [8, 1], strides = [1, 1]} : vector<8x17xf32> to vector<8x1xf32>
    %cst_2 = arith.constant 8.000000e+00 : f32
    %7 = vector.broadcast %cst_2 : f32 to vector<8x1xf32>
    %8 = arith.mulf %6, %7 : vector<8x1xf32>
    %9 = math.log %8 : vector<8x1xf32>
    %10 = vector.shape_cast %9 : vector<8x1xf32> to vector<1x8x1xf32>
    %cst_3 = arith.constant dense<0.000000e+00> : vector<1xf32>
    %11 = vector.multi_reduction <add>, %10, %cst_3 [1, 2] : vector<1x8x1xf32> to vector<1xf32>
    %12 = vector.shape_cast %11 : vector<1xf32> to vector<1x1x1xf32>
    %13 = vector.extract %12[0, 0, 0] : f32 from vector<1x1x1xf32>
    %14 = vector.shape_cast %5 : vector<8x17xf32> to vector<1x8x17xf32>
    %cst_4 = arith.constant dense<0.000000e+00> : vector<1xf32>
    %15 = vector.multi_reduction <add>, %14, %cst_4 [1, 2] : vector<1x8x17xf32> to vector<1xf32>
    %16 = vector.shape_cast %15 : vector<1xf32> to vector<1x1x1xf32>
    %17 = vector.extract %16[0, 0, 0] : f32 from vector<1x1x1xf32>
    %18 = arith.subf %13, %17 : f32
    %c0_5 = arith.constant 0 : index
    %c0_6 = arith.constant 0 : index
    %19 = memref.load %arg2[%c0_5, %c0_6] : memref<1x1xf32, #tpu.memory_space<smem>>
    memref.store %18, %arg2[%c0_5, %c0_6] : memref<1x1xf32, #tpu.memory_space<smem>>
    return
  }
  func.func @transform_0(%arg0: i32) -> (i32, i32) {
    %c0_i32 = arith.constant 0 : i32
    %c0_i32_0 = arith.constant 0 : i32
    return %arg0, %c0_i32 : i32, i32
  }
  func.func @transform_1(%arg0: i32) -> (i32, i32) {
    %c0_i32 = arith.constant 0 : i32
    %c0_i32_0 = arith.constant 0 : i32
    return %arg0, %c0_i32 : i32, i32
  }
}

</mosaic_0001>

<bundles_post_ra>
// kernel: tpu_custom_call.1
= control target key start
LH: loop header
LB: loop body
LE: loop exit
PB: predicated region body
PF: predicated region fallthrough
CT: control target
= control target key end

     0   :  { %6 = vsyncpa [#allocation3], 0  ;;  %s127_s0 = inlined_call_operand.hbm [shape: f32[8,17], index: 0, kind: input, shape index: {}]   ;;  %s128_s1 = inlined_call_operand.hbm [shape: f32[1,1], index: 1, kind: output, shape index: {}]  }
   0x1   :  { %7 = vsyncpa [#allocation4], 0  ;;  %s109_s6 = smov [#allocation2]  }
   0x2   :  { %s14_s7 = sshll.u32 %s109_s6, 4  ;;  %s15_s7 = int_to_ptr.vmem [resolvable:$true] %s14_s7 }
   0x3   :  { %s85_s8 = scalar_lea.vmem %s15_s7, 128  ;;  %p90_p1 = scmp.lt.s32.totalorder %s15_s7, %s15_s7 }
   0x4   :  { %p86_p0 = scmp.ne.s32.totalorder %s15_s7, %s85_s8  ;;  %p91_p2 = scmp.lt.s32.totalorder %s85_s8, %s85_s8 }
   0x6   :  { %p92_p3 = por %p91_p2, %p90_p1 }
   0x8   :  { %p93_p4 = pnand %p92_p3, %p86_p0 }
   0xa   :  { %96 = shalt.err (!%p93_p4)
}
   0xb   :  { %17 = dma.hbm_to_vmem [thread:$0]  %s127_s0, 128, %s15_s7, [#allocation3]  }
   0xc   :  { %105 = dma.done.wait [#allocation3], 128  }
   0xd   :  { %106 = vsyncadd [#allocation3], 4294967168  ;;  %v21_v0 = vld [vmem:[#allocation2] sm:$0xff]  ;;  %vm28_vm0 = vcmask 7168   ;;  %vm39_vm1 = vcmask 138240   ;;  %s110_s13 = smov [#allocation5]  }
   0xe   :  { %v22_v1 = vmul.f32 8.0, %v21_v0 }
  0x10   :  { %73 = vlog2.f32 %v22_v1  ;;  %v23_v2 = vadd.f32 1.0000008, %v22_v1 }
  0x12   :  { %75 = vlog2.f32 %v23_v2 }
  0x1d   :  { %v74_v3 = vpop.eup %73 }
  0x1e   :  { %v27_v4 = vmul.f32 0.6931472, %v74_v3 }
  0x1f   :  { %v76_v5 = vpop.eup %75 }
  0x20   :  { %v29_v6 = vsel %vm28_vm0, %v27_v4, 0.0  ;;  %v25_v7 = vmul.f32 0.6931472, %v76_v5 }
  0x21   :  { %30 = vadd.xlane.f32.xlu0 %v29_v6 }
  0x22   :  { %v40_v8 = vsel %vm39_vm1, %v25_v7, 0.0 }
  0x25   :  { %41 = vadd.xlane.f32.xlu0 %v40_v8 }
  0xaa   :  { %v31_v9 = vpop.xlane.xlu0 %30 }
  0xab   :  { %v32_v10 = vrot.slane %v31_v9, 4 }
  0xad   :  { %v33_v11 = vadd.f32 %v32_v10, %v31_v9 }
  0xae   :  { %v42_v12 = vpop.xlane.xlu0 %41 }
  0xaf   :  { %v34_v13 = vrot.slane %v33_v11, 2  ;;  %v43_v14 = vrot.slane %v42_v12, 4 }
  0xb1   :  { %v44_v15 = vadd.f32 %v43_v14, %v42_v12  ;;  %v35_v16 = vadd.f32 %v34_v13, %v33_v11 }
  0xb3   :  { %v45_v17 = vrot.slane %v44_v15, 2  ;;  %v36_v18 = vrot.slane %v35_v16, 1 }
  0xb5   :  { %v46_v19 = vadd.f32 %v45_v17, %v44_v15  ;;  %v37_v20 = vadd.f32 %v36_v18, %v35_v16 }
  0xb7   :  { %67 = vpush %v37_v20  ;;  %v47_v21 = vrot.slane %v46_v19, 1 }
  0xb9   :  { %v48_v22 = vadd.f32 %v47_v21, %v46_v19 }
  0xbb   :  { %69 = vpush %v48_v22 }
  0xe8   :  { %s68_s0 = spop %67 }
  0xec   :  { %s70_s11 = spop %69 }
  0xed   :  { %s50_s12 = ssub.f32 %s68_s0, %s70_s11 }
  0xef   :  { %52 = sst [smem:[#allocation5]] %s50_s12 }
  0xf0   :  { %60 = dma.smem_to_hbm %s110_s13, 16, %s128_s1, [#allocation4]  }
  0xf1   :  { %107 = dma.done.wait [#allocation4], 16  }
  0xf2   :  { %108 = vsyncadd [#allocation4], 4294967280 }
  0xf3   :  { %64 = sfence }
  0xf4   :  { %65 = vsyncpa [#allocation3], 1 }
  0xf5   :  { %66 = vsyncpa [#allocation4], 1 }

</bundles_post_ra>
